<compile_context>
chip_gen: v7x
topology: tpu7x:2x2x1
jax: 0.10.0
libtpu: 0.0.40
codegen_flags: <defaults>
</compile_context>

<pallas_src>
import functools

import jax
import jax.numpy as jnp
from jax.experimental import pallas as pl
from jax.experimental.pallas import tpu as pltpu

_VMEM_LIMIT_BYTES = 32 * 1024 * 1024


def autopad(k, p=None):
    if p is None:
        p = k // 2 if isinstance(k, int) else [x // 2 for x in k]
    return p


def _round_up(x, m):
    return (x + m - 1) // m * m


# ---------------------------------------------------------------------------
# Kernel 1: fused 1x1 conv  --  out = sum_i (x_i @ w_i) + bias  (+ SiLU)
# Single K step (no reduction grid, no accumulator scratch): Ghost 1x1 convs
# have small K, so every x_i / w_i K extent fits one VMEM block.
# ---------------------------------------------------------------------------
def _pointwise_kernel(*refs, n_in, act):
    # refs = x_0..x_{n-1} (tm, K_i) bf16, w_0..w_{n-1} (K_i, Cp) bf16,
    #        b (1, Cp) f32, o (tm, Cp) bf16
    o_ref = refs[-1]
    b_ref = refs[-2]
    y = jnp.dot(refs[0][...], refs[n_in][...],
                preferred_element_type=jnp.float32)
    for i in range(1, n_in):
        y = y + jnp.dot(refs[i][...], refs[n_in + i][...],
                        preferred_element_type=jnp.float32)
    y = y + b_ref[...]
    if act:                                   # SiLU = x * sigmoid(x), f32 epilogue
        y = y * jax.nn.sigmoid(y)
    o_ref[...] = y.astype(o_ref.dtype)


def _choose_tm(m):
    """Row tile: single tile when it fits comfortably (common Ghost case);
    otherwise ~512 rows, preferring a divisor of m so no M-padding copy is
    needed.  (A forced >=2-tile split only helps v7x; skipped here.)"""
    if m <= 1024:
        return m
    for tm in (512, 384, 256, 128, 64, 32, 16, 8):
        if m % tm == 0:
            return tm
    return 512            # rare fallback: pad M


def pointwise_conv_bn_act(xs, ws, bias, *, act):
    """sum_i xs[i] @ ws[i] + bias (+ SiLU).

    xs[i]: (M, K_i) activations.  K_i is used as-is (may carry lane padding from
           a previous stage; it is NOT padded here).
    ws[i]: (k_i, Cout) f32, BN scale folded, k_i <= K_i real rows placed at the
           top of the padded (K_i, Cp) weight (padded input lanes are zero).
    Returns (M, Cp) bf16, Cp = round_up(Cout, 128); padded output lanes are 0.
    """
    M = xs[0].shape[0]
    Cout = ws[0].shape[1]
    Cp = _round_up(Cout, 128)

    tm = _choose_tm(M)
    Mp = _round_up(M, tm)

    xps, wps = [], []
    for xx, ww in zip(xs, ws):
        assert xx.shape[0] == M and ww.shape[0] <= xx.shape[1]
        xx = xx.astype(jnp.bfloat16)
        if Mp != M:
            xx = jnp.pad(xx, ((0, Mp - M), (0, 0)))
        xps.append(xx)
        wp = jnp.zeros((xx.shape[1], Cp), jnp.bfloat16)
        wp = wp.at[:ww.shape[0], :Cout].set(ww.astype(jnp.bfloat16))
        wps.append(wp)
    bp = jnp.zeros((1, Cp), jnp.float32).at[0, :Cout].set(
        bias.astype(jnp.float32))

    # Advisory; weights are fetched once (constant index_map) so counted once.
    cost = pl.CostEstimate(
        flops=sum(2 * Mp * xp.shape[1] * Cp for xp in xps),
        transcendentals=Mp * Cp if act else 0,
        bytes_accessed=(sum(2 * Mp * xp.shape[1] for xp in xps)
                        + sum(2 * xp.shape[1] * Cp for xp in xps)
                        + 4 * Cp + 2 * Mp * Cp))

    in_specs = ([pl.BlockSpec((tm, xp.shape[1]), lambda i: (i, 0))
                 for xp in xps]
                + [pl.BlockSpec((wp.shape[0], Cp), lambda i: (0, 0))
                   for wp in wps]
                + [pl.BlockSpec((1, Cp), lambda i: (0, 0))])

    out = pl.pallas_call(
        functools.partial(_pointwise_kernel, n_in=len(xps), act=act),
        out_shape=jax.ShapeDtypeStruct((Mp, Cp), jnp.bfloat16),
        grid_spec=pltpu.PrefetchScalarGridSpec(
            num_scalar_prefetch=0,
            grid=(Mp // tm,),
            in_specs=in_specs,
            out_specs=pl.BlockSpec((tm, Cp), lambda i: (i, 0)),
        ),
        compiler_params=pltpu.CompilerParams(
            dimension_semantics=("parallel",),
            vmem_limit_bytes=_VMEM_LIMIT_BYTES),
        cost_estimate=cost,
    )(*xps, *wps, bp)
    if Mp != M:
        out = out[:M]
    return out


# ---------------------------------------------------------------------------
# Kernel 2: k x k depthwise conv (stride 1, 'same') + folded-BN bias (+ SiLU)
# ---------------------------------------------------------------------------
def _dwconv_kernel(x_ref, w_ref, b_ref, o_ref, pad_ref, strip_ref,
                   *, k, pad, H, W, SH, act):
    # x_ref:  (H, W, 128) bf16 (one image, one 128-lane channel block)
    # w_ref:  (k*k, 128) f32 (BN scale folded)      b_ref: (1, 128) f32
    # o_ref:  (H, W, 128) bf16
    # pad_ref:   (H+2p, W+2p, 128) bf16 scratch — in-kernel zero-padded slab
    # strip_ref: (SH+2p, W+2p, 128) f32 scratch — one bf16->f32 cast per strip
    pad_ref[...] = jnp.zeros_like(pad_ref)
    pad_ref[pad:pad + H, pad:pad + W, :] = x_ref[...]

    w = w_ref[...]                          # hoisted out of the strip loop
    b = b_ref[...]

    def strip(h0, hs):
        strip_ref[0:hs + 2 * pad, :, :] = (
            pad_ref[pl.ds(h0, hs + 2 * pad), :, :].astype(jnp.float32))
        acc = jnp.zeros((hs, W, 128), jnp.float32)
        t = 0
        for i in range(k):                  # k*k taps, unrolled (VPU MACs)
            for j in range(k):
                acc = acc + strip_ref[i:i + hs, j:j + W, :] * w[t]
                t += 1
        y = acc + b
        if act:
            y = y * jax.nn.sigmoid(y)
        o_ref[pl.ds(h0, hs), :, :] = y.astype(o_ref.dtype)

    nfull, rem = H // SH, H % SH
    if nfull > 0:
        def body(s, carry):
            strip(pl.multiple_of(s * SH, SH), SH)
            return carry
        jax.lax.fori_loop(0, nfull, body, 0)
    if rem:
        strip(nfull * SH, rem)


def dwconv_bn_act(xh, w_flat, bias, *, k, act):
    """Depthwise k x k conv (stride 1, same pad) + folded-BN bias (+ SiLU).

    xh:     (N, H, W, Cp) bf16, Cp % 128 == 0 (lane padding produced by the
            pointwise kernel is reused as-is; padded lanes are zero).
    w_flat: (k*k, C) f32 per-channel taps, BN scale folded, C <= Cp.
    """
    N, H, W, Cp = xh.shape
    assert Cp % 128 == 0
    C = w_flat.shape[1]
    pad = autopad(k)

    # Strip height: keep the f32 accumulator (SH, W, 128) within ~24 vregs.
    SH = max(1, min(8, 24 // max(1, -(-W // 8))))

    wk = jnp.zeros((k * k, Cp), jnp.float32).at[:, :C].set(
        w_flat.astype(jnp.float32))
    bk = jnp.zeros((1, Cp), jnp.float32).at[0, :C].set(
        bias.astype(jnp.float32))

    cost = pl.CostEstimate(
        flops=2 * N * H * W * Cp * k * k,
        transcendentals=N * H * W * Cp if act else 0,
        bytes_accessed=2 * N * H * W * Cp          # bf16 input
        + 2 * N * H * W * Cp                        # bf16 output
        + 4 * k * k * Cp + 4 * Cp)

    return pl.pallas_call(
        functools.partial(_dwconv_kernel, k=k, pad=pad, H=H, W=W, SH=SH,
                          act=act),
        out_shape=jax.ShapeDtypeStruct((N, H, W, Cp), jnp.bfloat16),
        grid_spec=pltpu.PrefetchScalarGridSpec(
            num_scalar_prefetch=0,
            grid=(N, Cp // 128),
            in_specs=[
                pl.BlockSpec((None, H, W, 128), lambda n, c: (n, 0, 0, c)),
                pl.BlockSpec((k * k, 128), lambda n, c: (0, c)),
                pl.BlockSpec((1, 128), lambda n, c: (0, c)),
            ],
            out_specs=pl.BlockSpec((None, H, W, 128),
                                   lambda n, c: (n, 0, 0, c)),
            scratch_shapes=[
                pltpu.VMEM((H + 2 * pad, W + 2 * pad, 128), jnp.bfloat16),
                pltpu.VMEM((SH + 2 * pad, W + 2 * pad, 128), jnp.float32),
            ],
        ),
        compiler_params=pltpu.CompilerParams(
            dimension_semantics=("parallel", "parallel"),
            vmem_limit_bytes=_VMEM_LIMIT_BYTES),
        cost_estimate=cost,
    )(xh.astype(jnp.bfloat16), wk, bk)


# ---------------------------------------------------------------------------
# GhostBottleneck module (parameters + Pallas forward + pure-JAX reference)
# ---------------------------------------------------------------------------
def _init_conv(key, c_in, c_out, k, groups=1):
    kw, kg, kb, km, kv = jax.random.split(key, 5)
    fan_in = (c_in // groups) * k * k
    bound = 1.0 / (fan_in ** 0.5)
    return dict(
        w=jax.random.uniform(kw, (c_out, c_in // groups, k, k),
                             jnp.float32, -bound, bound),
        gamma=jax.random.uniform(kg, (c_out,), jnp.float32, 0.5, 1.5),
        beta=jax.random.uniform(kb, (c_out,), jnp.float32, -0.5, 0.5),
        mean=jax.random.uniform(km, (c_out,), jnp.float32, -0.5, 0.5),
        var=jax.random.uniform(kv, (c_out,), jnp.float32, 0.5, 1.5),
    )


class GhostBottleneckPallas:
    """GhostBottleneck(c1, c2, k=3, s=1). BatchNorm uses eval-mode running stats."""

    def __init__(self, c1, c2, k=3, s=1, eps=1e-5, key=None):
        assert s == 1, "only the s == 1 (identity shortcut) path is implemented"
        # TODO(synk): s == 2 branch (strided DWConv stage + DWConv+Conv shortcut)
        #             and training-mode BatchNorm (batch stats) not implemented.
        self.c1, self.c2, self.k, self.s, self.eps = c1, c2, k, s, eps
        self.mid = c2 // 2           # GhostConv #1 output channels
        self.half = self.mid // 2    # GhostConv #1 primary branch channels
        if key is None:
            key = jax.random.PRNGKey(1)
        k1, k2, k3, k4 = jax.random.split(key, 4)
        # GhostConv(c1, mid, 1, 1, act=SiLU)
        self.g1_cv1 = _init_conv(k1, c1, self.half, 1, 1)                  # 1x1
        self.g1_cv2 = _init_conv(k2, self.half, self.half, 5, self.half)   # 5x5 DW
        # GhostConv(mid, c2, 1, 1, act=Identity)
        self.g2_cv1 = _init_conv(k3, self.mid, self.mid, 1, 1)             # 1x1
        self.g2_cv2 = _init_conv(k4, self.mid, self.mid, 5, self.mid)      # 5x5 DW

    def _fold_bn(self, p):
        scale = p["gamma"] / jnp.sqrt(p["var"] + self.eps)
        bias = p["beta"] - p["mean"] * scale
        return scale, bias

    # Pallas forward ---------------------------------------------------------
    def __call__(self, x):
        N, C, H, W = x.shape
        assert C == self.c1 == self.c2, "s == 1 identity shortcut needs c1 == c2"
        half, mid = self.half, self.mid
        cp1 = _round_up(half, 128)
        M = N * H * W

        xh_f32 = jnp.transpose(x, (0, 2, 3, 1))        # NCHW -> NHWC (once)
        xh = xh_f32.astype(jnp.bfloat16)

        # GhostConv #1 (act = SiLU)
        s1, b1 = self._fold_bn(self.g1_cv1)
        w1 = self.g1_cv1["w"].reshape(half, self.c1).T * s1[None, :]
        y1a = pointwise_conv_bn_act([xh.reshape(M, self.c1)], [w1], b1,
                                    act=True)                       # (M, cp1)
        y1a_h = y1a.reshape(N, H, W, cp1)

        s2, b2 = self._fold_bn(self.g1_cv2)
        wdw1 = (self.g1_cv2["w"].reshape(half, -1) * s2[:, None]).T  # (25, half)
        y1b_h = dwconv_bn_act(y1a_h, wdw1, b2, k=5, act=True)        # (N,H,W,cp1)

        # GhostConv #2 (act = Identity): concat folded into a 2-operand matmul.
        s3, b3 = self._fold_bn(self.g2_cv1)
        w2 = self.g2_cv1["w"].reshape(mid, mid).T * s3[None, :]      # (mid, mid)
        y2a = pointwise_conv_bn_act(
            [y1a, y1b_h.reshape(M, cp1)], [w2[:half], w2[half:]], b3,
            act=False)                                               # (M, cp2)
        cp2 = y2a.shape[1]
        y2a_h = y2a.reshape(N, H, W, cp2)

        s4, b4 = self._fold_bn(self.g2_cv2)
        wdw2 = (self.g2_cv2["w"].reshape(mid, -1) * s4[:, None]).T   # (25, mid)
        y2b_h = dwconv_bn_act(y2a_h, wdw2, b4, k=5, act=False)       # (N,H,W,cp2)

        # Single unpad + identity shortcut (s=1) + NHWC -> NCHW, fused by XLA.
        y2 = jnp.concatenate([y2a_h[..., :mid].astype(jnp.float32),
                              y2b_h[..., :mid].astype(jnp.float32)], axis=-1)
        out = y2 + xh_f32
        return jnp.transpose(out, (0, 3, 1, 2))

    # Pure-JAX reference (no Pallas) ------------------------------------------
    def _ref_conv(self, x, p, pad, groups, act):
        y = jax.lax.conv_general_dilated(
            x, p["w"], window_strides=(1, 1),
            padding=[(pad, pad), (pad, pad)],
            dimension_numbers=("NCHW", "OIHW", "NCHW"),
            feature_group_count=groups)
        scale, bias = self._fold_bn(p)
        y = y * scale[None, :, None, None] + bias[None, :, None, None]
        if act:
            y = y * jax.nn.sigmoid(y)
        return y

    def reference(self, x):
        y1a = self._ref_conv(x, self.g1_cv1, 0, 1, True)
        y1b = self._ref_conv(y1a, self.g1_cv2, 2, self.half, True)
        y1 = jnp.concatenate([y1a, y1b], axis=1)
        y2a = self._ref_conv(y1, self.g2_cv1, 0, 1, False)
        y2b = self._ref_conv(y2a, self.g2_cv2, 2, self.mid, False)
        y2 = jnp.concatenate([y2a, y2b], axis=1)
        return y2 + x


if __name__ == "__main__":
    # s=1 GhostBottleneck requires c1 == c2 (identity shortcut add), as in PyTorch.
    c1 = c2 = 8
    gb = GhostBottleneckPallas(c1, c2, k=3, s=1)

    x = jax.random.normal(jax.random.PRNGKey(0), (2, c1, 16, 16), jnp.float32)

    out = jax.block_until_ready(gb(x))
    ref = jax.block_until_ready(gb.reference(x))

    assert out.shape == ref.shape == (2, c2, 16, 16)
    # bf16 activations across 4 stacked conv+BN stages -> compare max abs error
    # against ~2% of the f32 reference's dynamic range (a semantic bug would
    # produce errors on the order of the outputs themselves, ~1-5).
    err = float(jnp.max(jnp.abs(out - ref)))
    tol = 2e-2 * float(jnp.maximum(1.0, jnp.max(jnp.abs(ref))))
    assert err <= tol, (err, tol)

    print("KERNEL_OK")
</pallas_src>

<mosaic_0001>
module attributes {stable_mosaic.version = 11 : i64} {
  func.func @_pointwise_kernel(%arg0: i32, %arg1: memref<512x8xbf16, #tpu.memory_space<vmem>>, %arg2: memref<8x128xbf16, #tpu.memory_space<vmem>>, %arg3: memref<1x128xf32, #tpu.memory_space<vmem>>, %arg4: memref<512x128xbf16, #tpu.memory_space<vmem>>) attributes {dimension_semantics = [#tpu.dimension_semantics<parallel>], iteration_bounds = array<i64: 1>, scalar_prefetch = 0 : i64, scratch_operands = 0 : i64, tpu.core_type = #tpu.core_type<tc>, window_params = [{transform_indices = @transform_0, window_bounds = array<i64: 512, 8>}, {pipeline_mode = #tpu.pipeline_mode<synchronous>, transform_indices = @transform_1, window_bounds = array<i64: 8, 128>}, {pipeline_mode = #tpu.pipeline_mode<synchronous>, transform_indices = @transform_2, window_bounds = array<i64: 1, 128>}, {transform_indices = @transform_3, window_bounds = array<i64: 512, 128>}]} {
    %c0 = arith.constant 0 : index
    %c0_0 = arith.constant 0 : index
    %0 = vector.load %arg1[%c0, %c0_0] : memref<512x8xbf16, #tpu.memory_space<vmem>>, vector<512x8xbf16>
    %c0_1 = arith.constant 0 : index
    %c0_2 = arith.constant 0 : index
    %1 = vector.load %arg2[%c0_1, %c0_2] : memref<8x128xbf16, #tpu.memory_space<vmem>>, vector<8x128xbf16>
    %cst = arith.constant dense<0.000000e+00> : vector<512x128xf32>
    %2 = tpu.matmul %0, %1, %cst {dimension_numbers = #tpu.dot_dimension_numbers<[1], [0], [0], [1], [0, 0, 1, 1], [], []>} : vector<512x8xbf16>, vector<8x128xbf16>, vector<512x128xf32> -> vector<512x128xf32>
    %c0_3 = arith.constant 0 : index
    %c0_4 = arith.constant 0 : index
    %3 = vector.load %arg3[%c0_3, %c0_4] : memref<1x128xf32, #tpu.memory_space<vmem>>, vector<1x128xf32>
    %4 = vector.broadcast %3 : vector<1x128xf32> to vector<512x128xf32>
    %5 = arith.addf %2, %4 : vector<512x128xf32>
    %6 = arith.negf %5 : vector<512x128xf32>
    %7 = math.exp %6 : vector<512x128xf32>
    %cst_5 = arith.constant 1.000000e+00 : f32
    %8 = vector.broadcast %cst_5 : f32 to vector<512x128xf32>
    %9 = arith.addf %8, %7 : vector<512x128xf32>
    %10 = arith.divf %8, %9 : vector<512x128xf32>
    %11 = arith.mulf %5, %10 : vector<512x128xf32>
    %12 = arith.truncf %11 : vector<512x128xf32> to vector<512x128xbf16>
    %c0_6 = arith.constant 0 : index
    %c0_7 = arith.constant 0 : index
    %13 = vector.load %arg4[%c0_6, %c0_7] : memref<512x128xbf16, #tpu.memory_space<vmem>>, vector<512x128xbf16>
    tpu.vector_store %arg4[%c0_6, %c0_7], %12 {strides = array<i32>} : memref<512x128xbf16, #tpu.memory_space<vmem>>, vector<512x128xbf16>,
    return
  }
  func.func @transform_0(%arg0: i32) -> (i32, i32) {
    %c0_i32 = arith.constant 0 : i32
    %c0_i32_0 = arith.constant 0 : i32
    return %arg0, %c0_i32 : i32, i32
  }
  func.func @transform_1(%arg0: i32) -> (i32, i32) {
    %c0_i32 = arith.constant 0 : i32
    %c0_i32_0 = arith.constant 0 : i32
    %c0_i32_1 = arith.constant 0 : i32
    return %c0_i32, %c0_i32_0 : i32, i32
  }
  func.func @transform_2(%arg0: i32) -> (i32, i32) {
    %c0_i32 = arith.constant 0 : i32
    %c0_i32_0 = arith.constant 0 : i32
    %c0_i32_1 = arith.constant 0 : i32
    return %c0_i32, %c0_i32_0 : i32, i32
  }
  func.func @transform_3(%arg0: i32) -> (i32, i32) {
    %c0_i32 = arith.constant 0 : i32
    %c0_i32_0 = arith.constant 0 : i32
    return %arg0, %c0_i32 : i32, i32
  }
}

</mosaic_0001>

<bundles_post_ra>
// kernel: tpu_custom_call.1
= control target key start
LH: loop header
LB: loop body
LE: loop exit
PB: predicated region body
PF: predicated region fallthrough
CT: control target
= control target key end

     0   :  { %vm345_vm0 = vcmask 1043456   ;;  %vm248_vm1 = vcmask 64512   ;;  %s2913_s0 = inlined_call_operand.vmem [shape: bf16[512,8], index: 0, kind: input, shape index: {}]   ;;  %s2914_s1 = inlined_call_operand.vmem [shape: bf16[8,128], index: 1, kind: input, shape index: {}]   ;;  %s2915_s2 = inlined_call_operand.vmem [shape: f32[1,128], index: 2, kind: input, shape index: {}]   ;;  %s2916_s3 = inlined_call_operand.hbm [shape: bf16[512,128], index: 3, kind: output, shape index: {}]  }
   0x1   :  { %v80_v0 = vld [vmem:[%s2914_s1] sm:$0xf]  ;;  %v1978_v4 = vld [vmem:[%s2913_s0 + $0x8] sm:$0xff]   ;;  %v1980_v6 = vld [vmem:[%s2913_s0 + $0x10] sm:$0xff]  }
   0x2   :  { %v1976_v1 = vld [vmem:[%s2913_s0] sm:$0xff]   ;;  %1971 = vmatprep.subr.msk.bf16.mxu0 %vm345_vm0, %v80_v0  ;;  %1972 = vmatprep.subr.msk.bf16.mxu1 %vm345_vm0, %v80_v0  ;;  %v347_v2 = vsel %vm345_vm0, %v80_v0, 0  ;;  %v1979_v5 = vld [vmem:[%s2913_s0 + $0x88] sm:$0xff]   ;;  %v1981_v7 = vld [vmem:[%s2913_s0 + $0x90] sm:$0xff]  }
   0x3   :  { %1904 = vmatpush3.bf16.msra.mxu0 %v347_v2  ;;  %1970 = vmatpush3.bf16.msra.mxu1 %v347_v2  ;;  %v1977_v3 = vld [vmem:[%s2913_s0 + $0x80] sm:$0xff]   ;;  %v1982_v8 = vld [vmem:[%s2913_s0 + $0x18] sm:$0xff]   ;;  %v1986_v12 = vld [vmem:[%s2913_s0 + $0x28] sm:$0xff]  }
   0x4   :  { %1905 = vmatprep.mubr.msk.bf16.mxu0 %vm248_vm1, %v1976_v1  ;;  %1937 = vmatprep.mubr.msk.bf16.mxu1 %vm248_vm1, %v1977_v3  ;;  %v1983_v9 = vld [vmem:[%s2913_s0 + $0x98] sm:$0xff]   ;;  %v1984_v10 = vld [vmem:[%s2913_s0 + $0x20] sm:$0xff]   ;;  %v1987_v13 = vld [vmem:[%s2913_s0 + $0xa8] sm:$0xff]  }
   0x5   :  { %v1985_v11 = vld [vmem:[%s2913_s0 + $0xa0] sm:$0xff]   ;;  %v1988_v14 = vld [vmem:[%s2913_s0 + $0x30] sm:$0xff]   ;;  %v1990_v16 = vld [vmem:[%s2913_s0 + $0x38] sm:$0xff]  }
   0x6   :  { %1906 = vmatmul.mubr.msk.bf16.vlgmr.msra.gmra.mrb[0].mxu0 %vm248_vm1, %v1978_v4  ;;  %1938 = vmatmul.mubr.msk.bf16.vlgmr.msra.gmra.mrb[0].mxu1 %vm248_vm1, %v1979_v5  ;;  %v1989_v15 = vld [vmem:[%s2913_s0 + $0xb0] sm:$0xff]   ;;  %v1991_v17 = vld [vmem:[%s2913_s0 + $0xb8] sm:$0xff]   ;;  %v1992_v18 = vld [vmem:[%s2913_s0 + $0x40] sm:$0xff]  }
   0x7   :  { %1909 = vmatprep.mubr.msk.bf16.mxu0 %vm248_vm1, %v1980_v6  ;;  %1941 = vmatprep.mubr.msk.bf16.mxu1 %vm248_vm1, %v1981_v7  ;;  %v1993_v19 = vld [vmem:[%s2913_s0 + $0xc0] sm:$0xff]  }
   0xe   :  { %1910 = vmatmul.mubr.msk.bf16.gmra.mrb[4].mxu0 %vm248_vm1, %v1982_v8  ;;  %1942 = vmatmul.mubr.msk.bf16.gmra.mrb[4].mxu1 %vm248_vm1, %v1983_v9 }
   0xf   :  { %1913 = vmatprep.mubr.msk.bf16.mxu0 %vm248_vm1, %v1984_v10  ;;  %1945 = vmatprep.mubr.msk.bf16.mxu1 %vm248_vm1, %v1985_v11 }
  0x16   :  { %1914 = vmatmul.mubr.msk.bf16.gmra.mrb[8].mxu0 %vm248_vm1, %v1986_v12  ;;  %1946 = vmatmul.mubr.msk.bf16.gmra.mrb[8].mxu1 %vm248_vm1, %v1987_v13 }
  0x17   :  { %1917 = vmatprep.mubr.msk.bf16.mxu0 %vm248_vm1, %v1988_v14  ;;  %1949 = vmatprep.mubr.msk.bf16.mxu1 %vm248_vm1, %v1989_v15 }
  0x1e   :  { %1918 = vmatmul.mubr.msk.bf16.gmra.mrb[12].mxu0 %vm248_vm1, %v1990_v16  ;;  %1950 = vmatmul.mubr.msk.bf16.gmra.mrb[12].mxu1 %vm248_vm1, %v1991_v17 }
  0x1f   :  { %1921 = vmatprep.mubr.msk.bf16.mxu0 %vm248_vm1, %v1992_v18  ;;  %1953 = vmatprep.mubr.msk.bf16.mxu1 %vm248_vm1, %v1993_v19 }
  0x20   :  { %8 = vsyncpa [#allocation3], 0  ;;  %v1994_v20 = vld [vmem:[%s2913_s0 + $0x48] sm:$0xff]   ;;  %v1996_v22 = vld [vmem:[%s2913_s0 + $0x50] sm:$0xff]  }
  0x21   :  { %v1995_v21 = vld [vmem:[%s2913_s0 + $0xc8] sm:$0xff]   ;;  %v1997_v23 = vld [vmem:[%s2913_s0 + $0xd0] sm:$0xff]   ;;  %v1998_v24 = vld [vmem:[%s2913_s0 + $0x58] sm:$0xff]  }
  0x22   :  { %v1999_v25 = vld [vmem:[%s2913_s0 + $0xd8] sm:$0xff]   ;;  %v2000_v26 = vld [vmem:[%s2913_s0 + $0x60] sm:$0xff]   ;;  %v2002_v28 = vld [vmem:[%s2913_s0 + $0x68] sm:$0xff]  }
  0x23   :  { %v2001_v27 = vld [vmem:[%s2913_s0 + $0xe0] sm:$0xff]   ;;  %v2003_v29 = vld [vmem:[%s2913_s0 + $0xe8] sm:$0xff]   ;;  %v2004_v30 = vld [vmem:[%s2913_s0 + $0x70] sm:$0xff]  }
  0x24   :  { %v2005_v31 = vld [vmem:[%s2913_s0 + $0xf0] sm:$0xff]   ;;  %v2006_v32 = vld [vmem:[%s2913_s0 + $0x78] sm:$0xff]   ;;  %v2446_v34 = vld [vmem:[%s2915_s2] ss:$0 sm:$0xff] }
  0x25   :  { %v2007_v33 = vld [vmem:[%s2913_s0 + $0xf8] sm:$0xff]  }
  0x26   :  { %1922 = vmatmul.mubr.msk.bf16.gmra.mrb[16].mxu0 %vm248_vm1, %v1994_v20  ;;  %1954 = vmatmul.mubr.msk.bf16.gmra.mrb[16].mxu1 %vm248_vm1, %v1995_v21 }
  0x27   :  { %1925 = vmatprep.mubr.msk.bf16.mxu0 %vm248_vm1, %v1996_v22  ;;  %1957 = vmatprep.mubr.msk.bf16.mxu1 %vm248_vm1, %v1997_v23 }
  0x2e   :  { %1926 = vmatmul.mubr.msk.bf16.gmra.mrb[20].mxu0 %vm248_vm1, %v1998_v24  ;;  %1958 = vmatmul.mubr.msk.bf16.gmra.mrb[20].mxu1 %vm248_vm1, %v1999_v25 }
  0x2f   :  { %1929 = vmatprep.mubr.msk.bf16.mxu0 %vm248_vm1, %v2000_v26  ;;  %1961 = vmatprep.mubr.msk.bf16.mxu1 %vm248_vm1, %v2001_v27 }
  0x36   :  { %1930 = vmatmul.mubr.msk.bf16.gmra.mrb[24].mxu0 %vm248_vm1, %v2002_v28  ;;  %1962 = vmatmul.mubr.msk.bf16.gmra.mrb[24].mxu1 %vm248_vm1, %v2003_v29 }
  0x37   :  { %1933 = vmatprep.mubr.msk.bf16.mxu0 %vm248_vm1, %v2004_v30  ;;  %1965 = vmatprep.mubr.msk.bf16.mxu1 %vm248_vm1, %v2005_v31 }
  0x3e   :  { %1934 = vmatmul.mubr.msk.bf16.gmra.mrb[28].mxu0 %vm248_vm1, %v2006_v32  ;;  %1966 = vmatmul.mubr.msk.bf16.gmra.mrb[28].mxu1 %vm248_vm1, %v2007_v33 }
  0xd9   :  { %v1907_v35 = vpop.f32.mrb[0].mxu0  ;;  %v1939_v37 = vpop.f32.mrb[0].mxu1 }
  0xda   :  { %v2449_v36 = vadd.f32 %v1907_v35, %v2446_v34  ;;  %v383_v38 = vpop.f32.mrb[1].mxu0  ;;  %v2452_v39 = vadd.f32 %v1939_v37, %v2446_v34  ;;  %v511_v41 = vpop.f32.mrb[1].mxu1 }
  0xdb   :  { %v2455_v40 = vadd.f32 %v2446_v34, %v383_v38  ;;  %v1908_v42 = vpop.f32.mrb[2].mxu0  ;;  %v2459_v44 = vadd.f32 %v2446_v34, %v511_v41  ;;  %v1940_v46 = vpop.f32.mrb[2].mxu1 }
  0xdc   :  { %v1489_v43 = vmul.f32 -1.442695, %v2449_v36  ;;  %v2462_v45 = vadd.f32 %v1908_v42, %v2446_v34  ;;  %v386_v47 = vpop.f32.mrb[3].mxu0  ;;  %v1521_v48 = vmul.f32 -1.442695, %v2452_v39  ;;  %v2467_v50 = vadd.f32 %v1940_v46, %v2446_v34  ;;  %v514_v52 = vpop.f32.mrb[3].mxu1 }
  0xdd   :  { %v1487_v49 = vmul.f32 -1.442695, %v2455_v40  ;;  %v2470_v51 = vadd.f32 %v2446_v34, %v386_v47  ;;  %v1519_v53 = vmul.f32 -1.442695, %v2459_v44  ;;  %v2475_v55 = vadd.f32 %v2446_v34, %v514_v52 }
  0xde   :  { %2008 = vpow2.f32 %v1489_v43  ;;  %v1490_v54 = vmul.f32 -1.442695, %v2462_v45  ;;  %v1522_v56 = vmul.f32 -1.442695, %v2467_v50 }
  0xdf   :  { %2010 = vpow2.f32 %v1521_v48  ;;  %v1488_v57 = vmul.f32 -1.442695, %v2470_v51  ;;  %v1520_v58 = vmul.f32 -1.442695, %v2475_v55 }
  0xe0   :  { %2012 = vpow2.f32 %v1487_v49 }
  0xe1   :  { %2014 = vpow2.f32 %v1519_v53  ;;  %v1911_v59 = vpop.f32.mrb[4].mxu0  ;;  %v1943_v61 = vpop.f32.mrb[4].mxu1 }
  0xe2   :  { %2016 = vpow2.f32 %v1490_v54  ;;  %v2481_v60 = vadd.f32 %v1911_v59, %v2446_v34  ;;  %v399_v62 = vpop.f32.mrb[5].mxu0  ;;  %v2484_v63 = vadd.f32 %v1943_v61, %v2446_v34  ;;  %v527_v1 = vpop.f32.mrb[5].mxu1 }
  0xe3   :  { %2018 = vpow2.f32 %v1522_v56  ;;  %v2487_v0 = vadd.f32 %v2446_v34, %v399_v62  ;;  %v1912_v2 = vpop.f32.mrb[6].mxu0  ;;  %v2491_v4 = vadd.f32 %v2446_v34, %v527_v1  ;;  %v1944_v6 = vpop.f32.mrb[6].mxu1 }
  0xe4   :  { %2020 = vpow2.f32 %v1488_v57  ;;  %v1493_v3 = vmul.f32 -1.442695, %v2481_v60  ;;  %v2494_v5 = vadd.f32 %v1912_v2, %v2446_v34  ;;  %v402_v7 = vpop.f32.mrb[7].mxu0  ;;  %v1525_v8 = vmul.f32 -1.442695, %v2484_v63  ;;  %v530_v10 = vpop.f32.mrb[7].mxu1 }
  0xe5   :  { %2022 = vpow2.f32 %v1520_v58  ;;  %v1491_v9 = vmul.f32 -1.442695, %v2487_v0  ;;  %v1523_v11 = vmul.f32 -1.442695, %v2491_v4  ;;  %v2501_v31 = vadd.f32 %v1944_v6, %v2446_v34 }
  0xe6   :  { %2024 = vpow2.f32 %v1493_v3  ;;  %v1494_v12 = vmul.f32 -1.442695, %v2494_v5  ;;  %v2504_v37 = vadd.f32 %v2446_v34, %v402_v7  ;;  %v2508_v49 = vadd.f32 %v2446_v34, %v530_v10 }
  0xe7   :  { %2026 = vpow2.f32 %v1525_v8  ;;  %v1526_v48 = vmul.f32 -1.442695, %v2501_v31 }
  0xe8   :  { %v2009_v13 = vpop.eup %2008  ;;  %2028 = vpow2.f32 %v1491_v9  ;;  %v1492_v56 = vmul.f32 -1.442695, %v2504_v37 }
  0xe9   :  { %v2011_v14 = vpop.eup %2010  ;;  %v832_v15 = vadd.f32 1.0, %v2009_v13  ;;  %2030 = vpow2.f32 %v1523_v11  ;;  %v1915_v16 = vpop.f32.mrb[8].mxu0 }
  0xea   :  { %v2013_v17 = vpop.eup %2012  ;;  %v864_v18 = vadd.f32 1.0, %v2011_v14  ;;  %2032 = vpow2.f32 %v1494_v12  ;;  %v1947_v19 = vpop.f32.mrb[8].mxu1  ;;  %v2512_v57 = vadd.f32 %v1915_v16, %v2446_v34 }
  0xeb   :  { %v415_v20 = vpop.f32.mrb[9].mxu0  ;;  %v2015_v21 = vpop.eup %2014  ;;  %2034 = vrcp.f32 %v832_v15  ;;  %v830_v22 = vadd.f32 1.0, %v2013_v17  ;;  %v2517_v1 = vadd.f32 %v1947_v19, %v2446_v34  ;;  %v1524_v19 = vmul.f32 -1.442695, %v2508_v49 }
  0xec   :  { %v543_v23 = vpop.f32.mrb[9].mxu1  ;;  %v1916_v24 = vpop.f32.mrb[10].mxu0  ;;  %2036 = vrcp.f32 %v864_v18  ;;  %v862_v26 = vadd.f32 1.0, %v2015_v21  ;;  %v2520_v2 = vadd.f32 %v2446_v34, %v415_v20  ;;  %v1497_v21 = vmul.f32 -1.442695, %v2512_v57 }
  0xed   :  { %v2017_v25 = vpop.eup %2016  ;;  %v1948_v27 = vpop.f32.mrb[10].mxu1  ;;  %2038 = vrcp.f32 %v830_v22  ;;  %v2527_v9 = vadd.f32 %v2446_v34, %v543_v23  ;;  %v2530_v10 = vadd.f32 %v1916_v24, %v2446_v34  ;;  %v1529_v22 = vmul.f32 -1.442695, %v2517_v1 }
  0xee   :  { %v418_v28 = vpop.f32.mrb[11].mxu0  ;;  %v2019_v29 = vpop.eup %2018  ;;  %v833_v30 = vadd.f32 1.0, %v2017_v25  ;;  %2040 = vrcp.f32 %v862_v26  ;;  %v2537_v15 = vadd.f32 %v1948_v27, %v2446_v34  ;;  %v1495_v24 = vmul.f32 -1.442695, %v2520_v2 }
  0xef   :  { %v546_v32 = vpop.f32.mrb[11].mxu1  ;;  %v2021_v33 = vpop.eup %2020  ;;  %v865_v35 = vadd.f32 1.0, %v2019_v29  ;;  %v2540_v16 = vadd.f32 %v2446_v34, %v418_v28  ;;  %v1527_v25 = vmul.f32 -1.442695, %v2527_v9  ;;  %v1498_v26 = vmul.f32 -1.442695, %v2530_v10 }
  0xf0   :  { %v2023_v38 = vpop.eup %2022  ;;  %2042 = vrcp.f32 %v833_v30  ;;  %v831_v41 = vadd.f32 1.0, %v2021_v33  ;;  %v1530_v28 = vmul.f32 -1.442695, %v2537_v15  ;;  %v2553_v30 = vadd.f32 %v2446_v34, %v546_v32 }
  0xf1   :  { %v2025_v42 = vpop.eup %2024  ;;  %2044 = vrcp.f32 %v865_v35  ;;  %v863_v43 = vadd.f32 1.0, %v2023_v38  ;;  %v1919_v52 = vpop.f32.mrb[12].mxu0  ;;  %v1496_v29 = vmul.f32 -1.442695, %v2540_v16 }
  0xf2   :  { %v2027_v46 = vpop.eup %2026  ;;  %2046 = vrcp.f32 %v831_v41  ;;  %v836_v47 = vadd.f32 1.0, %v2025_v42  ;;  %v1951_v58 = vpop.f32.mrb[12].mxu1  ;;  %v2560_v42 = vadd.f32 %v1919_v52, %v2446_v34 }
  0xf3   :  { %v2029_v53 = vpop.eup %2028  ;;  %2048 = vrcp.f32 %v863_v43  ;;  %v868_v54 = vadd.f32 1.0, %v2027_v46  ;;  %v2514_v59 = vpop.f32.mrb[13].mxu0 }
  0xf4   :  { %v2031_v61 = vpop.eup %2030  ;;  %2050 = vrcp.f32 %v836_v47  ;;  %v834_v62 = vadd.f32 1.0, %v2029_v53  ;;  %v2522_v3 = vpop.f32.mrb[13].mxu1  ;;  %v2569_v53 = vadd.f32 %v1951_v58, %v2446_v34 }
  0xf5   :  { %v2524_v6 = vpop.f32.mrb[14].mxu0  ;;  %v2033_v7 = vpop.eup %2032  ;;  %2052 = vrcp.f32 %v868_v54  ;;  %v866_v8 = vadd.f32 1.0, %v2031_v61 }
  0xf6   :  { %v2532_v11 = vpop.f32.mrb[14].mxu1  ;;  %v2534_v12 = vpop.f32.mrb[15].mxu0  ;;  %2054 = vrcp.f32 %v834_v62  ;;  %v837_v14 = vadd.f32 1.0, %v2033_v7 }
  0xf7   :  { %v2035_v13 = vpop.eup %2034  ;;  %v2542_v17 = vpop.f32.mrb[15].mxu1  ;;  %2056 = vrcp.f32 %v866_v8 }
  0xf8   :  { %v2037_v18 = vpop.eup %2036  ;;  %2058 = vrcp.f32 %v837_v14  ;;  %v1024_v38 = vmul.f32 %v2035_v13, %v2449_v36 }
  0xf9   :  { %v2039_v20 = vpop.eup %2038  ;;  %2060 = vpow2.f32 %v1526_v48  ;;  %v2555_v33 = vpop.f32.mrb[16].mxu0  ;;  %v1056_v48 = vmul.f32 %v2037_v18, %v2452_v39 }
  0xfa   :  { %v2041_v23 = vpop.eup %2040  ;;  %2062 = vpow2.f32 %v1492_v56  ;;  %v2562_v43 = vpop.f32.mrb[16].mxu1  ;;  %v1022_v52 = vmul.f32 %v2039_v20, %v2455_v40 }
  0xfb   :  { %v2043_v27 = vpop.eup %2042  ;;  %2064 = vpow2.f32 %v1524_v19  ;;  %v2564_v46 = vpop.f32.mrb[17].mxu0  ;;  %v1054_v7 = vmul.f32 %v2041_v23, %v2459_v44  ;;  %v1501_v44 = vmul.f32 -1.442695, %v2560_v42 }
  0xfc   :  { %v2045_v35 = vpop.eup %2044  ;;  %v1025_v41 = vmul.f32 %v2043_v27, %v2462_v45  ;;  %2066 = vpow2.f32 %v1497_v21  ;;  %v2571_v36 = vpop.f32.mrb[17].mxu1 }
  0xfd   :  { %v2047_v47 = vpop.eup %2046  ;;  %v1057_v32 = vmul.f32 %v2045_v35, %v2467_v50  ;;  %v2573_v45 = vpop.f32.mrb[18].mxu0  ;;  %2068 = vpow2.f32 %v1529_v22 }
  0xfe   :  { %v2049_v54 = vpop.eup %2048  ;;  %v1687_v56 = vpack.c.bf16 %v1025_v41, %v1024_v38  ;;  %v1023_v61 = vmul.f32 %v2047_v47, %v2470_v51  ;;  %v2577_v62 = vpop.f32.mrb[18].mxu1  ;;  %2070 = vpow2.f32 %v1495_v24  ;;  %v1528_v51 = vmul.f32 -1.442695, %v2553_v30 }
  0xff   :  { %v2579_v39 = vpop.f32.mrb[19].mxu0  ;;  %v2051_v50 = vpop.eup %2050  ;;  %v1767_v58 = vpack.c.bf16 %v1057_v32, %v1056_v48  ;;  %v1055_v8 = vmul.f32 %v2049_v54, %v2475_v55  ;;  %2072 = vpow2.f32 %v1527_v25  ;;  %v1533_v55 = vmul.f32 -1.442695, %v2569_v53 }
 0x100   :  { %v2583_v13 = vpop.f32.mrb[19].mxu1  ;;  %v2585_v14 = vpop.eup %2052  ;;  %1839 = vst [vmem:[#allocation2 + $0x8] sm:$0xff] %v1687_v56   ;;  %v1682_v40 = vpack.c.bf16 %v1023_v61, %v1022_v52  ;;  %2074 = vpow2.f32 %v1498_v26  ;;  %v1028_v24 = vmul.f32 %v2051_v50, %v2481_v60  ;;  %v2614_v50 = vadd.f32 %v2446_v34, %v2514_v59 }
 0x101   :  { %v2588_v18 = vpop.eup %2054  ;;  %1855 = vst [vmem:[#allocation2 + $0x88] sm:$0xff] %v1767_v58   ;;  %v1762_v19 = vpack.c.bf16 %v1055_v8, %v1054_v7  ;;  %2076 = vpow2.f32 %v1530_v28  ;;  %v2594_v22 = vpop.f32.mrb[20].mxu0  ;;  %v2618_v8 = vadd.f32 %v2446_v34, %v2522_v3  ;;  %v2626_v59 = vadd.f32 %v2532_v11, %v2446_v34 }
 0x102   :  { %v2591_v20 = vpop.eup %2056  ;;  %1683 = vst [vmem:[#allocation2] sm:$0xff] %v1682_v40   ;;  %2078 = vpow2.f32 %v1496_v29  ;;  %v2598_v26 = vpop.f32.mrb[20].mxu1 }
 0x103   :  { %v2059_v21 = vpop.eup %2058  ;;  %1854 = vst [vmem:[#allocation2 + $0x80] sm:$0xff] %v1762_v19   ;;  %2080 = vpow2.f32 %v1528_v51  ;;  %v2600_v27 = vpop.f32.mrb[21].mxu0  ;;  %v2622_v19 = vadd.f32 %v2524_v6, %v2446_v34  ;;  %v1531_v11 = vmul.f32 -1.442695, %v2618_v8 }
 0x104   :  { %v2061_v23 = vpop.eup %2060  ;;  %v1029_v25 = vmul.f32 %v2059_v21, %v2494_v5  ;;  %2082 = vpow2.f32 %v1501_v44  ;;  %v2602_v28 = vpop.f32.mrb[21].mxu1 }
 0x105   :  { %v2063_v35 = vpop.eup %2062  ;;  %v869_v38 = vadd.f32 1.0, %v2061_v23  ;;  %v2604_v41 = vpop.f32.mrb[22].mxu0  ;;  %2084 = vpow2.f32 %v1533_v55 }
 0x106   :  { %v2065_v29 = vpop.eup %2064  ;;  %v1697_v47 = vpack.c.bf16 %v1029_v25, %v1028_v24  ;;  %v835_v48 = vadd.f32 1.0, %v2063_v35  ;;  %v2606_v32 = vpop.f32.mrb[22].mxu1  ;;  %v1499_v24 = vmul.f32 -1.442695, %v2614_v50  ;;  %v2633_v25 = vadd.f32 %v2446_v34, %v2534_v12 }
 0x107   :  { %v2608_v60 = vpop.f32.mrb[23].mxu0  ;;  %v2067_v5 = vpop.eup %2066  ;;  %2086 = vrcp.f32 %v869_v38  ;;  %v867_v54 = vadd.f32 1.0, %v2065_v29 }
 0x108   :  { %v2610_v52 = vpop.f32.mrb[23].mxu1  ;;  %v2069_v56 = vpop.eup %2068  ;;  %1841 = vst [vmem:[#allocation2 + $0x18] sm:$0xff] %v1697_v47   ;;  %2088 = vrcp.f32 %v835_v48  ;;  %v840_v61 = vadd.f32 1.0, %v2067_v5 }
 0x109   :  { %v2071_v7 = vpop.eup %2070  ;;  %2090 = vrcp.f32 %v867_v54  ;;  %v872_v58 = vadd.f32 1.0, %v2069_v56  ;;  %v2628_v21 = vpop.f32.mrb[24].mxu0  ;;  %v1502_v56 = vmul.f32 -1.442695, %v2622_v19 }
 0x10a   :  { %v2073_v40 = vpop.eup %2072  ;;  %2092 = vrcp.f32 %v840_v61  ;;  %v838_v51 = vadd.f32 1.0, %v2071_v7  ;;  %v2635_v6 = vpop.f32.mrb[24].mxu1 }
 0x10b   :  { %v2075_v44 = vpop.eup %2074  ;;  %2094 = vrcp.f32 %v872_v58  ;;  %v870_v55 = vadd.f32 1.0, %v2073_v40  ;;  %v2637_v35 = vpop.f32.mrb[25].mxu0  ;;  %v1534_v40 = vmul.f32 -1.442695, %v2626_v59 }
 0x10c   :  { %v2077_v23 = vpop.eup %2076  ;;  %2096 = vrcp.f32 %v838_v51  ;;  %v841_v3 = vadd.f32 1.0, %v2075_v44  ;;  %v2640_v47 = vpop.f32.mrb[25].mxu1  ;;  %v2652_v51 = vadd.f32 %v2446_v34, %v2542_v17  ;;  %v2667_v17 = vadd.f32 %v2446_v34, %v2564_v46 }
 0x10d   :  { %v2079_v38 = vpop.eup %2078  ;;  %2098 = vrcp.f32 %v870_v55  ;;  %v873_v29 = vadd.f32 1.0, %v2077_v23  ;;  %v2642_v48 = vpop.f32.mrb[26].mxu0  ;;  %v2681_v46 = vadd.f32 %v2573_v45, %v2446_v34 }
 0x10e   :  { %v2081_v5 = vpop.eup %2080  ;;  %2100 = vrcp.f32 %v841_v3  ;;  %v839_v54 = vadd.f32 1.0, %v2079_v38  ;;  %v2645_v12 = vpop.f32.mrb[26].mxu1  ;;  %v1500_v3 = vmul.f32 -1.442695, %v2633_v25  ;;  %v2659_v38 = vadd.f32 %v2555_v33, %v2446_v34 }
 0x10f   :  { %2918 = vst [vmem:[#allocation5_spill] sm:$0xff] %v2645_v12  ;;  %v2647_v61 = vpop.f32.mrb[27].mxu0  ;;  %v2083_v7 = vpop.eup %2082  ;;  %2102 = vrcp.f32 %v873_v29  ;;  %v871_v58 = vadd.f32 1.0, %v2081_v5  ;;  %v2663_v5 = vadd.f32 %v2562_v43, %v2446_v34  ;;  %v2674_v33 = vadd.f32 %v2446_v34, %v2571_v36 }
 0x110   :  { %2919 = vst [vmem:[#allocation6_spill] sm:$0xff] %v2647_v61  ;;  %v2654_v44 = vpop.f32.mrb[27].mxu1  ;;  %v2085_v55 = vpop.eup %2084  ;;  %2104 = vrcp.f32 %v839_v54  ;;  %v844_v23 = vadd.f32 1.0, %v2083_v7  ;;  %v1060_v54 = vmul.f32 %v2585_v14, %v2484_v63  ;;  %v1026_v43 = vmul.f32 %v2588_v18, %v2487_v0 }
 0x111   :  { %2920 = vst [vmem:[#allocation7_spill] sm:$0xff] %v2654_v44  ;;  %v2087_v61 = vpop.eup %2086  ;;  %2106 = vrcp.f32 %v871_v58  ;;  %v876_v29 = vadd.f32 1.0, %v2085_v55  ;;  %2921 = vst [vmem:[#allocation8_spill] sm:$0xff] %v2674_v33  ;;  %v2683_v12 = vpop.f32.mrb[28].mxu0  ;;  %v1532_v45 = vmul.f32 -1.442695, %v2652_v51 }
 0x112   :  { %v2089_v44 = vpop.eup %2088  ;;  %v1061_v7 = vmul.f32 %v2087_v61, %v2501_v31  ;;  %2108 = vrcp.f32 %v844_v23  ;;  %v1058_v31 = vmul.f32 %v2591_v20, %v2491_v4  ;;  %v2688_v61 = vpop.f32.mrb[28].mxu1 }
 0x113   :  { %v2091_v58 = vpop.eup %2090  ;;  %v1027_v55 = vmul.f32 %v2089_v44, %v2504_v37  ;;  %2110 = vrcp.f32 %v876_v29  ;;  %v2690_v0 = vpop.f32.mrb[29].mxu0  ;;  %v2695_v44 = vadd.f32 %v2577_v62, %v2446_v34  ;;  %v2704_v29 = vadd.f32 %v2446_v34, %v2579_v39 }
 0x114   :  { %v2093_v63 = vpop.eup %2092  ;;  %v1777_v14 = vpack.c.bf16 %v1061_v7, %v1060_v54  ;;  %v1059_v36 = vmul.f32 %v2091_v58, %v2508_v49  ;;  %2112 = vpow2.f32 %v1499_v24  ;;  %v2697_v23 = vpop.f32.mrb[29].mxu1  ;;  %v1505_v24 = vmul.f32 -1.442695, %v2659_v38 }
 0x115   :  { %v2095_v37 = vpop.eup %2094  ;;  %v1692_v18 = vpack.c.bf16 %v1027_v55, %v1026_v43  ;;  %2114 = vpow2.f32 %v1531_v11  ;;  %v2699_v4 = vpop.f32.mrb[30].mxu0  ;;  %v1537_v7 = vmul.f32 -1.442695, %v2663_v5  ;;  %v1535_v55 = vmul.f32 -1.442695, %v2674_v33 }
 0x116   :  { %2922 = vst [vmem:[#allocation9_spill] sm:$0xff] %v2699_v4  ;;  %v2097_v20 = vpop.eup %2096  ;;  %1857 = vst [vmem:[#allocation2 + $0x98] sm:$0xff] %v1777_v14   ;;  %v1772_v49 = vpack.c.bf16 %v1059_v36, %v1058_v31  ;;  %2116 = vpow2.f32 %v1502_v56  ;;  %v2706_v11 = vpop.f32.mrb[30].mxu1  ;;  %v1503_v56 = vmul.f32 -1.442695, %v2667_v17  ;;  %v1032_v14 = vmul.f32 %v2093_v63, %v2512_v57 }
 0x117   :  { %2923 = vst [vmem:[#allocation10_spill] sm:$0xff] %v2706_v11  ;;  %v2708_v54 = vpop.f32.mrb[31].mxu0  ;;  %v2099_v62 = vpop.eup %2098  ;;  %1840 = vst [vmem:[#allocation2 + $0x10] sm:$0xff] %v1692_v18   ;;  %2118 = vpow2.f32 %v1534_v40  ;;  %v1506_v39 = vmul.f32 -1.442695, %v2681_v46  ;;  %v1030_v11 = vmul.f32 %v2097_v20, %v2520_v2 }
 0x118   :  { %2924 = vst [vmem:[#allocation11_spill] sm:$0xff] %v2708_v54  ;;  %v2711_v58 = vpop.f32.mrb[31].mxu1  ;;  %v2101_v43 = vpop.eup %2100  ;;  %1856 = vst [vmem:[#allocation2 + $0x90] sm:$0xff] %v1772_v49   ;;  %2120 = vpow2.f32 %v1500_v3  ;;  %v1538_v40 = vmul.f32 -1.442695, %v2695_v44 }
 0x119   :  { %2925 = vst [vmem:[#allocation12_spill] sm:$0xff] %v2711_v58  ;;  %v2103_v31 = vpop.eup %2102  ;;  %v1033_v36 = vmul.f32 %v2101_v43, %v2530_v10  ;;  %2122 = vpow2.f32 %v1532_v45  ;;  %v1064_v58 = vmul.f32 %v2095_v37, %v2517_v1  ;;  %v1504_v3 = vmul.f32 -1.442695, %v2704_v29 }
 0x11a   :  { %v2105_v18 = vpop.eup %2104  ;;  %v1065_v49 = vmul.f32 %v2103_v31, %v2537_v15  ;;  %2124 = vpow2.f32 %v1505_v24  ;;  %v1062_v10 = vmul.f32 %v2099_v62, %v2527_v9 }
 0x11b   :  { %v2107_v54 = vpop.eup %2106  ;;  %v1707_v4 = vpack.c.bf16 %v1033_v36, %v1032_v14  ;;  %v1031_v33 = vmul.f32 %v2105_v18, %v2540_v16  ;;  %2126 = vpow2.f32 %v1537_v7  ;;  %v2736_v14 = vadd.f32 %v2594_v22, %v2446_v34 }
 0x11c   :  { %v2724_v57 = vpop.eup %2108  ;;  %v1787_v63 = vpack.c.bf16 %v1065_v49, %v1064_v58  ;;  %v1063_v45 = vmul.f32 %v2107_v54, %v2553_v30  ;;  %2128 = vpow2.f32 %v1503_v56  ;;  %v2740_v36 = vadd.f32 %v2598_v26, %v2446_v34 }
 0x11d   :  { %v2728_v1 = vpop.eup %2110  ;;  %1843 = vst [vmem:[#allocation2 + $0x28] sm:$0xff] %v1707_v4   ;;  %v1702_v15 = vpack.c.bf16 %v1031_v33, %v1030_v11  ;;  %2130 = vpow2.f32 %v1535_v55  ;;  %v2732_v55 = vadd.f32 %v2446_v34, %v2583_v13  ;;  %v2744_v49 = vadd.f32 %v2446_v34, %v2600_v27 }
 0x11e   :  { %v2113_v37 = vpop.eup %2112  ;;  %1859 = vst [vmem:[#allocation2 + $0xa8] sm:$0xff] %v1787_v63   ;;  %v1782_v2 = vpack.c.bf16 %v1063_v45, %v1062_v10  ;;  %2132 = vpow2.f32 %v1506_v39  ;;  %v2748_v13 = vadd.f32 %v2446_v34, %v2602_v28  ;;  %v2752_v22 = vadd.f32 %v2604_v41, %v2446_v34 }
 0x11f   :  { %v2115_v20 = vpop.eup %2114  ;;  %1842 = vst [vmem:[#allocation2 + $0x20] sm:$0xff] %v1702_v15   ;;  %v842_v16 = vadd.f32 1.0, %v2113_v37  ;;  %2134 = vpow2.f32 %v1538_v40  ;;  %v2756_v26 = vadd.f32 %v2606_v32, %v2446_v34  ;;  %v2760_v27 = vadd.f32 %v2446_v34, %v2608_v60 }
 0x120   :  { %v2117_v24 = vpop.eup %2116  ;;  %1858 = vst [vmem:[#allocation2 + $0xa0] sm:$0xff] %v1782_v2   ;;  %v874_v9 = vadd.f32 1.0, %v2115_v20  ;;  %2136 = vpow2.f32 %v1504_v3  ;;  %v1536_v37 = vmul.f32 -1.442695, %v2732_v55  ;;  %v1509_v2 = vmul.f32 -1.442695, %v2736_v14 }
 0x121   :  { %v2119_v62 = vpop.eup %2118  ;;  %2138 = vrcp.f32 %v842_v16  ;;  %v845_v30 = vadd.f32 1.0, %v2117_v24  ;;  %v1541_v32 = vmul.f32 -1.442695, %v2740_v36  ;;  %v1507_v16 = vmul.f32 -1.442695, %v2744_v49 }
 0x122   :  { %v2121_v54 = vpop.eup %2120  ;;  %2140 = vrcp.f32 %v874_v9  ;;  %v877_v4 = vadd.f32 1.0, %v2119_v62  ;;  %v1539_v9 = vmul.f32 -1.442695, %v2748_v13  ;;  %v1510_v60 = vmul.f32 -1.442695, %v2752_v22 }
 0x123   :  { %v2123_v33 = vpop.eup %2122  ;;  %2142 = vrcp.f32 %v845_v30  ;;  %v843_v11 = vadd.f32 1.0, %v2121_v54  ;;  %v1542_v62 = vmul.f32 -1.442695, %v2756_v26  ;;  %v1508_v54 = vmul.f32 -1.442695, %v2760_v27 }
 0x124   :  { %v2125_v7 = vpop.eup %2124  ;;  %2144 = vrcp.f32 %v877_v4  ;;  %v875_v58 = vadd.f32 1.0, %v2123_v33  ;;  %v2772_v4 = vadd.f32 %v2446_v34, %v2610_v52  ;;  %v2776_v33 = vadd.f32 %v2628_v21, %v2446_v34 }
 0x125   :  { %v2127_v43 = vpop.eup %2126  ;;  %2146 = vrcp.f32 %v843_v11  ;;  %v848_v56 = vadd.f32 1.0, %v2125_v7  ;;  %v1036_v7 = vmul.f32 %v2724_v57, %v2560_v42  ;;  %v1068_v52 = vmul.f32 %v2728_v1, %v2569_v53 }
 0x126   :  { %v2129_v39 = vpop.eup %2128  ;;  %2148 = vrcp.f32 %v875_v58  ;;  %v880_v31 = vadd.f32 1.0, %v2127_v43  ;;  %v2783_v43 = vadd.f32 %v2635_v6, %v2446_v34  ;;  %v2790_v21 = vadd.f32 %v2446_v34, %v2637_v35 }
 0x127   :  { %v2131_v40 = vpop.eup %2130  ;;  %2150 = vrcp.f32 %v848_v56  ;;  %v846_v18 = vadd.f32 1.0, %v2129_v39  ;;  %v1540_v35 = vmul.f32 -1.442695, %v2772_v4 }
 0x128   :  { %v2133_v3 = vpop.eup %2132  ;;  %2152 = vrcp.f32 %v880_v31  ;;  %v878_v10 = vadd.f32 1.0, %v2131_v40 }
 0x129   :  { %v2135_v63 = vpop.eup %2134  ;;  %2154 = vrcp.f32 %v846_v18  ;;  %v849_v45 = vadd.f32 1.0, %v2133_v3 }
 0x12a   :  { %v2137_v28 = vpop.eup %2136  ;;  %2156 = vrcp.f32 %v878_v10  ;;  %v881_v15 = vadd.f32 1.0, %v2135_v63 }
 0x12b   :  { %v2139_v41 = vpop.eup %2138  ;;  %2158 = vrcp.f32 %v849_v45  ;;  %v847_v20 = vadd.f32 1.0, %v2137_v28  ;;  %v1511_v45 = vmul.f32 -1.442695, %v2790_v21 }
 0x12c   :  { %v2141_v24 = vpop.eup %2140  ;;  %2160 = vrcp.f32 %v881_v15  ;;  %v1034_v42 = vmul.f32 %v2139_v41, %v2614_v50  ;;  %v2799_v50 = vadd.f32 %v2446_v34, %v2640_v47 }
 0x12d   :  { %v2143_v30 = vpop.eup %2142  ;;  %2162 = vrcp.f32 %v847_v20  ;;  %v1066_v40 = vmul.f32 %v2141_v24, %v2618_v8  ;;  %v1513_v8 = vmul.f32 -1.442695, %v2776_v33 }
 0x12e   :  { %v2145_v11 = vpop.eup %2144  ;;  %v1037_v58 = vmul.f32 %v2143_v30, %v2622_v19  ;;  %2164 = vpow2.f32 %v1536_v37  ;;  %v1543_v37 = vmul.f32 -1.442695, %v2799_v50 }
 0x12f   :  { %v2147_v56 = vpop.eup %2146  ;;  %v1069_v39 = vmul.f32 %v2145_v11, %v2626_v59  ;;  %2166 = vpow2.f32 %v1509_v2 }
 0x130   :  { %v2149_v31 = vpop.eup %2148  ;;  %v1717_v19 = vpack.c.bf16 %v1037_v58, %v1036_v7  ;;  %v1035_v57 = vmul.f32 %v2147_v56, %v2633_v25  ;;  %2168 = vpow2.f32 %v1541_v32 }
 0x131   :  { %v2151_v6 = vpop.eup %2150  ;;  %v1797_v18 = vpack.c.bf16 %v1069_v39, %v1068_v52  ;;  %v1067_v53 = vmul.f32 %v2149_v31, %v2652_v51  ;;  %2170 = vpow2.f32 %v1507_v16  ;;  %v1545_v51 = vmul.f32 -1.442695, %v2783_v43 }
 0x132   :  { %v2153_v59 = vpop.eup %2152  ;;  %1845 = vst [vmem:[#allocation2 + $0x38] sm:$0xff] %v1717_v19   ;;  %v1712_v1 = vpack.c.bf16 %v1035_v57, %v1034_v42  ;;  %2172 = vpow2.f32 %v1539_v9  ;;  %v1040_v47 = vmul.f32 %v2151_v6, %v2659_v38  ;;  %v2815_v31 = vadd.f32 %v2642_v48, %v2446_v34  ;;  %v2926_v57 = vld [vmem:[#allocation5_spill] sm:$0xff] }
 0x133   :  { %v2155_v3 = vpop.eup %2154  ;;  %1861 = vst [vmem:[#allocation2 + $0xb8] sm:$0xff] %v1797_v18   ;;  %v1792_v25 = vpack.c.bf16 %v1067_v53, %v1066_v40  ;;  %2174 = vpow2.f32 %v1510_v60  ;;  %v1072_v41 = vmul.f32 %v2153_v59, %v2663_v5  ;;  %v2819_v6 = vadd.f32 %v2926_v57, %v2446_v34  ;;  %v2927_v40 = vld [vmem:[#allocation6_spill] sm:$0xff] }
 0x134   :  { %v2802_v10 = vpop.eup %2156  ;;  %1844 = vst [vmem:[#allocation2 + $0x30] sm:$0xff] %v1712_v1   ;;  %2176 = vpow2.f32 %v1542_v62  ;;  %v1038_v16 = vmul.f32 %v2155_v3, %v2667_v17  ;;  %v2823_v18 = vadd.f32 %v2446_v34, %v2927_v40 }
 0x135   :  { %v2159_v63 = vpop.eup %2158  ;;  %1860 = vst [vmem:[#allocation2 + $0xb0] sm:$0xff] %v1792_v25   ;;  %2178 = vpow2.f32 %v1508_v54  ;;  %v1514_v25 = vmul.f32 -1.442695, %v2815_v31 }
 0x136   :  { %v2161_v28 = vpop.eup %2160  ;;  %v1041_v15 = vmul.f32 %v2159_v63, %v2681_v46  ;;  %2180 = vpow2.f32 %v1540_v35 }
 0x137   :  { %v2163_v2 = vpop.eup %2162  ;;  %v1073_v20 = vmul.f32 %v2161_v28, %v2695_v44  ;;  %2182 = vpow2.f32 %v1513_v8  ;;  %v2928_v8 = vld [vmem:[#allocation7_spill] sm:$0xff]  ;;  %v1546_v28 = vmul.f32 -1.442695, %v2819_v6 }
 0x138   :  { %v2165_v32 = vpop.eup %2164  ;;  %v1727_v24 = vpack.c.bf16 %v1041_v15, %v1040_v47  ;;  %v1039_v9 = vmul.f32 %v2163_v2, %v2704_v29  ;;  %2184 = vpow2.f32 %v1545_v51  ;;  %v2828_v51 = vadd.f32 %v2446_v34, %v2928_v8 }
 0x139   :  { %v2167_v60 = vpop.eup %2166  ;;  %v1807_v38 = vpack.c.bf16 %v1073_v20, %v1072_v41  ;;  %v879_v62 = vadd.f32 1.0, %v2165_v32  ;;  %2186 = vpow2.f32 %v1511_v45  ;;  %v1512_v47 = vmul.f32 -1.442695, %v2823_v18 }
 0x13a   :  { %v2169_v46 = vpop.eup %2168  ;;  %1847 = vst [vmem:[#allocation2 + $0x48] sm:$0xff] %v1727_v24   ;;  %v1722_v30 = vpack.c.bf16 %v1039_v9, %v1038_v16  ;;  %v852_v54 = vadd.f32 1.0, %v2167_v60  ;;  %2188 = vpow2.f32 %v1543_v37  ;;  %v2834_v15 = vadd.f32 %v2683_v12, %v2446_v34  ;;  %v2929_v16 = vld [vmem:[#allocation8_spill] sm:$0xff]  ;;  %v2930_v9 = vld [vmem:[#allocation9_spill] sm:$0xff] }
 0x13b   :  { %v2171_v5 = vpop.eup %2170  ;;  %1863 = vst [vmem:[#allocation2 + $0xc8] sm:$0xff] %v1807_v38   ;;  %2190 = vrcp.f32 %v879_v62  ;;  %v884_v44 = vadd.f32 1.0, %v2169_v46  ;;  %v2838_v2 = vadd.f32 %v2688_v61, %v2446_v34  ;;  %v2842_v41 = vadd.f32 %v2446_v34, %v2690_v0  ;;  %v2931_v38 = vld [vmem:[#allocation10_spill] sm:$0xff] }
 0x13c   :  { %v2173_v11 = vpop.eup %2172  ;;  %1846 = vst [vmem:[#allocation2 + $0x40] sm:$0xff] %v1722_v30   ;;  %2192 = vrcp.f32 %v852_v54  ;;  %v850_v17 = vadd.f32 1.0, %v2171_v5  ;;  %v2846_v20 = vadd.f32 %v2446_v34, %v2697_v23  ;;  %v1070_v24 = vmul.f32 %v2802_v10, %v2929_v16  ;;  %v2932_v30 = vld [vmem:[#allocation11_spill] sm:$0xff] }
 0x13d   :  { %v2175_v7 = vpop.eup %2174  ;;  %2194 = vrcp.f32 %v884_v44  ;;  %v882_v29 = vadd.f32 1.0, %v2173_v11  ;;  %v2853_v60 = vadd.f32 %v2930_v9, %v2446_v34  ;;  %v1544_v0 = vmul.f32 -1.442695, %v2828_v51 }
 0x13e   :  { %v2177_v58 = vpop.eup %2176  ;;  %2196 = vrcp.f32 %v850_v17  ;;  %v853_v56 = vadd.f32 1.0, %v2175_v7  ;;  %v2858_v62 = vadd.f32 %v2931_v38, %v2446_v34  ;;  %v1517_v10 = vmul.f32 -1.442695, %v2834_v15 }
 0x13f   :  { %v2179_v52 = vpop.eup %2178  ;;  %2198 = vrcp.f32 %v882_v29  ;;  %v885_v39 = vadd.f32 1.0, %v2177_v58  ;;  %v1549_v44 = vmul.f32 -1.442695, %v2838_v2  ;;  %v1515_v11 = vmul.f32 -1.442695, %v2842_v41  ;;  %v2933_v29 = vld [vmem:[#allocation12_spill] sm:$0xff] }
 0x140   :  { %v2181_v42 = vpop.eup %2180  ;;  %2200 = vrcp.f32 %v853_v56  ;;  %v851_v19 = vadd.f32 1.0, %v2179_v52  ;;  %v1547_v17 = vmul.f32 -1.442695, %v2846_v20  ;;  %v1518_v7 = vmul.f32 -1.442695, %v2853_v60 }
 0x141   :  { %v2183_v53 = vpop.eup %2182  ;;  %2202 = vrcp.f32 %v885_v39  ;;  %v883_v59 = vadd.f32 1.0, %v2181_v42  ;;  %v1550_v42 = vmul.f32 -1.442695, %v2858_v62 }
 0x142   :  { %v2185_v1 = vpop.eup %2184  ;;  %2204 = vrcp.f32 %v851_v19  ;;  %v856_v35 = vadd.f32 1.0, %v2183_v53 }
 0x143   :  { %v2187_v3 = vpop.eup %2186  ;;  %2206 = vrcp.f32 %v883_v59  ;;  %v888_v48 = vadd.f32 1.0, %v2185_v1 }
 0x144   :  { %v2189_v63 = vpop.eup %2188  ;;  %v854_v45 = vadd.f32 1.0, %v2187_v3  ;;  %2208 = vrcp.f32 %v856_v35 }
 0x145   :  { %v2191_v37 = vpop.eup %2190  ;;  %2210 = vrcp.f32 %v888_v48 }
 0x146   :  { %v2193_v32 = vpop.eup %2192  ;;  %v1071_v12 = vmul.f32 %v2191_v37, %v2732_v55  ;;  %2212 = vrcp.f32 %v854_v45  ;;  %v2264_v55 = vld [vmem:[%s2915_s2] ss:$0 sm:$0xff]  ;;  %s2289_s2 = smov [#allocation2]  }
 0x147   :  { %v2195_v61 = vpop.eup %2194  ;;  %2214 = vpow2.f32 %v1514_v25  ;;  %v2865_v54 = vadd.f32 %v2264_v55, %v2932_v30  ;;  %v2872_v58 = vadd.f32 %v2264_v55, %v2933_v29  ;;  %v1044_v52 = vmul.f32 %v2193_v32, %v2736_v14  ;;  %s1411_s24 = sshll.u32 %s2289_s2, 4  ;;  %s1412_s24 = int_to_ptr.vmem [resolvable:$true] %s1411_s24 }
 0x148   :  { %v2197_v23 = vpop.eup %2196  ;;  %v1802_v46 = vpack.c.bf16 %v1071_v12, %v1070_v24  ;;  %2216 = vpow2.f32 %v1546_v28  ;;  %v1076_v57 = vmul.f32 %v2195_v61, %v2740_v36  ;;  %s2265_s25 = scalar_lea.vmem %s1412_s24, 4096  ;;  %p2270_p1 = scmp.lt.s32.totalorder %s1412_s24, %s1412_s24 }
 0x149   :  { %v2199_v5 = vpop.eup %2198  ;;  %2218 = vpow2.f32 %v1512_v47  ;;  %v1516_v53 = vmul.f32 -1.442695, %v2865_v54  ;;  %v1042_v1 = vmul.f32 %v2197_v23, %v2744_v49  ;;  %v886_v49 = vadd.f32 1.0, %v2189_v63  ;;  %p2266_p0 = scmp.ne.s32.totalorder %s1412_s24, %s2265_s25  ;;  %p2271_p2 = scmp.lt.s32.totalorder %s2265_s25, %s2265_s25 }
 0x14a   :  { %v2201_v34 = vpop.eup %2200  ;;  %1862 = vst [vmem:[#allocation2 + $0xc0] sm:$0xff] %v1802_v46   ;;  %2220 = vpow2.f32 %v1544_v0  ;;  %v1074_v14 = vmul.f32 %v2199_v5, %v2748_v13 }
 0x14b   :  { %v2203_v56 = vpop.eup %2202  ;;  %v1045_v39 = vmul.f32 %v2201_v34, %v2752_v22  ;;  %2222 = vpow2.f32 %v1517_v10  ;;  %p2272_p3 = por %p2271_p2, %p2270_p1 }
 0x14c   :  { %v2205_v19 = vpop.eup %2204  ;;  %v1077_v40 = vmul.f32 %v2203_v56, %v2756_v26  ;;  %2224 = vpow2.f32 %v1549_v44  ;;  %v1548_v26 = vmul.f32 -1.442695, %v2872_v58 }
 0x14d   :  { %v2207_v59 = vpop.eup %2206  ;;  %v1737_v35 = vpack.c.bf16 %v1045_v39, %v1044_v52  ;;  %v1043_v3 = vmul.f32 %v2205_v19, %v2760_v27  ;;  %2226 = vpow2.f32 %v1515_v11  ;;  %p2273_p4 = pnand %p2272_p3, %p2266_p0 }
 0x14e   :  { %v1817_v22 = vpack.c.bf16 %v1077_v40, %v1076_v57  ;;  %v1075_v48 = vmul.f32 %v2207_v59, %v2772_v4  ;;  %v2209_v25 = vpop.eup %2208  ;;  %2228 = vpow2.f32 %v1547_v17 }
 0x14f   :  { %1849 = vst [vmem:[#allocation2 + $0x58] sm:$0xff] %v1737_v35   ;;  %v1732_v36 = vpack.c.bf16 %v1043_v3, %v1042_v1  ;;  %v2211_v8 = vpop.eup %2210  ;;  %2230 = vpow2.f32 %v1518_v7  ;;  %v1048_v52 = vmul.f32 %v2209_v25, %v2776_v33 }
 0x150   :  { %1865 = vst [vmem:[#allocation2 + $0xd8] sm:$0xff] %v1817_v22   ;;  %v1812_v45 = vpack.c.bf16 %v1075_v48, %v1074_v14  ;;  %v2213_v28 = vpop.eup %2212  ;;  %2232 = vpow2.f32 %v1550_v42  ;;  %v1080_v19 = vmul.f32 %v2211_v8, %v2783_v43 }
 0x151   :  { %1848 = vst [vmem:[#allocation2 + $0x50] sm:$0xff] %v1732_v36   ;;  %v2215_v27 = vpop.eup %2214  ;;  %2234 = vpow2.f32 %v1516_v53  ;;  %v1046_v53 = vmul.f32 %v2213_v28, %v2790_v21 }
 0x152   :  { %1864 = vst [vmem:[#allocation2 + $0xd0] sm:$0xff] %v1812_v45   ;;  %v2217_v13 = vpop.eup %2216  ;;  %v857_v4 = vadd.f32 1.0, %v2215_v27  ;;  %2236 = vpow2.f32 %v1548_v26 }
 0x153   :  { %v2219_v47 = vpop.eup %2218  ;;  %2238 = vrcp.f32 %v886_v49  ;;  %v889_v37 = vadd.f32 1.0, %v2217_v13 }
 0x154   :  { %v2221_v32 = vpop.eup %2220  ;;  %2240 = vrcp.f32 %v857_v4  ;;  %v855_v16 = vadd.f32 1.0, %v2219_v47 }
 0x155   :  { %v2223_v24 = vpop.eup %2222  ;;  %2242 = vrcp.f32 %v889_v37  ;;  %v887_v12 = vadd.f32 1.0, %v2221_v32 }
 0x156   :  { %v2225_v63 = vpop.eup %2224  ;;  %2244 = vrcp.f32 %v855_v16  ;;  %v860_v9 = vadd.f32 1.0, %v2223_v24 }
 0x157   :  { %v2227_v61 = vpop.eup %2226  ;;  %2246 = vrcp.f32 %v887_v12  ;;  %v892_v0 = vadd.f32 1.0, %v2225_v63 }
 0x158   :  { %v2229_v38 = vpop.eup %2228  ;;  %2248 = vrcp.f32 %v860_v9  ;;  %v858_v23 = vadd.f32 1.0, %v2227_v61 }
 0x159   :  { %v2231_v46 = vpop.eup %2230  ;;  %2250 = vrcp.f32 %v892_v0  ;;  %v890_v10 = vadd.f32 1.0, %v2229_v38 }
 0x15a   :  { %v2233_v55 = vpop.eup %2232  ;;  %2252 = vrcp.f32 %v858_v23  ;;  %v861_v30 = vadd.f32 1.0, %v2231_v46 }
 0x15b   :  { %v2235_v5 = vpop.eup %2234  ;;  %2254 = vrcp.f32 %v890_v10  ;;  %v893_v44 = vadd.f32 1.0, %v2233_v55 }
 0x15c   :  { %v2237_v11 = vpop.eup %2236  ;;  %2256 = vrcp.f32 %v861_v30  ;;  %v859_v34 = vadd.f32 1.0, %v2235_v5 }
 0x15d   :  { %v2239_v17 = vpop.eup %2238  ;;  %2258 = vrcp.f32 %v893_v44  ;;  %v891_v7 = vadd.f32 1.0, %v2237_v11 }
 0x15e   :  { %v2241_v29 = vpop.eup %2240  ;;  %2260 = vrcp.f32 %v859_v34  ;;  %v1078_v3 = vmul.f32 %v2239_v17, %v2799_v50 }
 0x15f   :  { %v2243_v56 = vpop.eup %2242  ;;  %v1049_v39 = vmul.f32 %v2241_v29, %v2815_v31  ;;  %2262 = vrcp.f32 %v891_v7 }
 0x160   :  { %v2245_v42 = vpop.eup %2244  ;;  %v1081_v57 = vmul.f32 %v2243_v56, %v2819_v6 }
 0x161   :  { %v2247_v40 = vpop.eup %2246  ;;  %v1747_v59 = vpack.c.bf16 %v1049_v39, %v1048_v52  ;;  %v1047_v1 = vmul.f32 %v2245_v42, %v2823_v18 }
 0x162   :  { %v2249_v35 = vpop.eup %2248  ;;  %v1827_v14 = vpack.c.bf16 %v1081_v57, %v1080_v19  ;;  %v1079_v33 = vmul.f32 %v2247_v40, %v2828_v51 }
 0x163   :  { %v2251_v22 = vpop.eup %2250  ;;  %1851 = vst [vmem:[#allocation2 + $0x68] sm:$0xff] %v1747_v59   ;;  %v1742_v31 = vpack.c.bf16 %v1047_v1, %v1046_v53  ;;  %v1052_v36 = vmul.f32 %v2249_v35, %v2834_v15 }
 0x164   :  { %v2253_v48 = vpop.eup %2252  ;;  %1867 = vst [vmem:[#allocation2 + $0xe8] sm:$0xff] %v1827_v14   ;;  %v1822_v43 = vpack.c.bf16 %v1079_v33, %v1078_v3  ;;  %v1084_v50 = vmul.f32 %v2251_v22, %v2838_v2 }
 0x165   :  { %v2255_v25 = vpop.eup %2254  ;;  %1850 = vst [vmem:[#allocation2 + $0x60] sm:$0xff] %v1742_v31   ;;  %v1050_v45 = vmul.f32 %v2253_v48, %v2842_v41 }
 0x166   :  { %v2257_v6 = vpop.eup %2256  ;;  %1866 = vst [vmem:[#allocation2 + $0xe0] sm:$0xff] %v1822_v43   ;;  %v1082_v27 = vmul.f32 %v2255_v25, %v2846_v20 }
 0x167   :  { %v2259_v21 = vpop.eup %2258  ;;  %v1053_v18 = vmul.f32 %v2257_v6, %v2853_v60 }
 0x168   :  { %v2261_v26 = vpop.eup %2260  ;;  %v1085_v51 = vmul.f32 %v2259_v21, %v2858_v62 }
 0x169   :  { %v2263_v8 = vpop.eup %2262  ;;  %v1757_v49 = vpack.c.bf16 %v1053_v18, %v1052_v36  ;;  %v1051_v28 = vmul.f32 %v2261_v26, %v2865_v54 }
 0x16a   :  { %v1837_v13 = vpack.c.bf16 %v1085_v51, %v1084_v50  ;;  %v1083_v15 = vmul.f32 %v2263_v8, %v2872_v58 }
 0x16b   :  { %1853 = vst [vmem:[#allocation2 + $0x78] sm:$0xff] %v1757_v49   ;;  %v1752_v60 = vpack.c.bf16 %v1051_v28, %v1050_v45 }
 0x16c   :  { %1869 = vst [vmem:[#allocation2 + $0xf8] sm:$0xff] %v1837_v13   ;;  %v1832_v2 = vpack.c.bf16 %v1083_v15, %v1082_v27 }
 0x16d   :  { %1852 = vst [vmem:[#allocation2 + $0x70] sm:$0xff] %v1752_v60  }
 0x16e   :  { %1868 = vst [vmem:[#allocation2 + $0xf0] sm:$0xff] %v1832_v2  }
 0x16f   :  { %2276 = shalt.err (!%p2273_p4)
}
 0x170   :  { %s2277_s28 = scalar_lea.hbm %s2916_s3, 4096 }
 0x171   :  { %p2278_p5 = scmp.ne.s32.totalorder %s2916_s3, %s2277_s28  ;;  %p2281_p6 = scmp.lt.u32.totalorder %s2277_s28, %s2916_s3 }
 0x173   :  { %p2283_p7 = pnand %p2281_p6, %p2278_p5 }
 0x175   :  { %2286 = shalt.err (!%p2283_p7)
}
 0x176   :  { %s2290_s6 = smov 64   ;;  %s2291_s7 = smov 4  }
 0x177   :  { %1417 = dma.vmem_to_hbm [thread:$0]  %s1412_s24, 4096, %s2916_s3, [#allocation3], %s2290_s6, %s2290_s6, %s2291_s7  }
 0x178   :  { %2287 = dma.done.wait [#allocation3], 4096  }
 0x179   :  { %2288 = vsyncadd [#allocation3], 4294963200 }
 0x17a   :  { %1421 = vsyncpa [#allocation3], 1 }

</bundles_post_ra>
